<compile_context>
chip_gen: v7x
topology: tpu7x:2x2x1
jax: 0.10.0
libtpu: 0.0.40
codegen_flags: <defaults>
</compile_context>

<pallas_src>
import functools

import jax
import jax.numpy as jnp
from jax.experimental import pallas as pl
from jax.experimental.pallas import tpu as pltpu


def _final_tanh_f2_kernel(x_ref, ws_ref, bs_ref, wout_ref, bout_ref, o_ref, *,
                          n_layers):
    # x_ref:    (TM, HC)       flattened (batch*node) activation tile
    # ws_ref:   (L, HC, HC)    stacked 1x1-conv weights, stored (in, out)
    # bs_ref:   (L, 1, HC)     stacked biases (f32)
    # wout_ref: (HC, HO)       linear_out weight, stored (in, out), HO = ic*hc
    # bout_ref: (1, HO)        linear_out bias (f32)
    # o_ref:    (TM, HO)
    h = x_ref[...]                                            # compute dtype
    for l in range(n_layers):                                 # unrolled
        w = ws_ref[l]                                         # (HC, HC)
        h = jnp.dot(h.astype(w.dtype), w,
                    preferred_element_type=jnp.float32)       # f32 accumulate
        h = jnp.maximum(h + bs_ref[l], 0.0)                   # f32 bias + relu
    w_out = wout_ref[...]
    out = jnp.dot(h.astype(w_out.dtype), w_out,
                  preferred_element_type=jnp.float32)
    o_ref[...] = jnp.tanh(out + bout_ref[...]).astype(o_ref.dtype)


def _pick_tile_m(M, tile_m):
    """Pick an M-tile that needs no wrapper pad and, when possible, >= 2 steps."""
    if M <= tile_m:
        # Full-dimension block is always legal.  Split in two (if 8-aligned)
        # so v7x's two TensorCores both get a "parallel" grid step.
        half = M // 2
        if M >= 16 and M % 2 == 0 and half % 8 == 0:
            return half
        return M
    # Prefer a sublane-aligned tile in [tile_m//2, tile_m] that divides M
    # exactly (no ragged last block); otherwise accept a ragged last block
    # which Pallas masks on writeback.
    hi = tile_m - (tile_m % 8)
    lo = max(8, (tile_m // 2) - ((tile_m // 2) % 8))
    for cand in range(hi, lo - 1, -8):
        if M % cand == 0:
            return cand
    return hi


def final_tanh_f2_pallas(z, ws, bs, w_out, b_out, *, hidden_channels,
                         input_channels, tile_m=2048,
                         compute_dtype=jnp.bfloat16, out_dtype=jnp.bfloat16):
    """z: (B, N, hidden_channels) -> (B, N, hidden_channels, input_channels)."""
    B, N, hc = z.shape
    L = ws.shape[0]
    ho = w_out.shape[1]                       # input_channels * hidden_channels

    # Fold batch * nodes into the matmul M dimension (lane-dense, MXU-friendly).
    M = B * N
    x = z.reshape(M, hc).astype(compute_dtype)
    ws_c = ws.astype(compute_dtype)
    wout_c = w_out.astype(compute_dtype)
    bs_f = bs.astype(jnp.float32)             # elementwise work stays f32
    bout_f = b_out.astype(jnp.float32)

    tm = _pick_tile_m(M, tile_m)
    grid_m = pl.cdiv(M, tm)

    kernel = functools.partial(_final_tanh_f2_kernel, n_layers=L)

    out_flat = pl.pallas_call(
        kernel,
        out_shape=jax.ShapeDtypeStruct((M, ho), out_dtype),
        grid_spec=pltpu.PrefetchScalarGridSpec(
            num_scalar_prefetch=0,
            grid=(grid_m,),
            in_specs=[
                pl.BlockSpec((tm, hc), lambda m: (m, 0)),        # activations
                pl.BlockSpec((L, hc, hc), lambda m: (0, 0, 0)),  # stacked W
                pl.BlockSpec((L, 1, hc), lambda m: (0, 0, 0)),   # stacked b
                pl.BlockSpec((hc, ho), lambda m: (0, 0)),        # W_out
                pl.BlockSpec((1, ho), lambda m: (0, 0)),         # b_out
            ],
            out_specs=pl.BlockSpec((tm, ho), lambda m: (m, 0)),
        ),
        compiler_params=pltpu.CompilerParams(
            dimension_semantics=("parallel",)),
    )(x, ws_c, bs_f, wout_c, bout_f)

    # Contiguous reshape: output channel j <-> (h_idx = j // ic, i_idx = j % ic),
    # matching PyTorch's .view(..., hidden_channels, input_channels).
    return out_flat.reshape(B, N, hidden_channels, input_channels)


def _final_tanh_f2_xla(z, ws, bs, w_out, b_out, *, hidden_channels,
                       input_channels):
    """Plain-XLA path for tiny M (kernel launch overhead > actual work)."""
    B, N, _ = z.shape
    h = z.astype(jnp.float32)
    for l in range(ws.shape[0]):
        h = jax.nn.relu(h @ ws[l].astype(jnp.float32) + bs[l].astype(jnp.float32))
    out = jnp.tanh(h @ w_out.astype(jnp.float32) + b_out.astype(jnp.float32))
    return out.reshape(B, N, hidden_channels, input_channels)


def final_tanh_f2(z, ws, bs, w_out, b_out, *, hidden_channels, input_channels,
                  tile_m=2048, compute_dtype=jnp.bfloat16,
                  out_dtype=jnp.bfloat16, min_m_for_pallas=1024):
    """Dispatcher: XLA fallback at tiny M, Pallas kernel otherwise."""
    B, N, _ = z.shape
    if B * N < min_m_for_pallas:
        return _final_tanh_f2_xla(z, ws, bs, w_out, b_out,
                                  hidden_channels=hidden_channels,
                                  input_channels=input_channels)
    return final_tanh_f2_pallas(z, ws, bs, w_out, b_out,
                                hidden_channels=hidden_channels,
                                input_channels=input_channels,
                                tile_m=tile_m, compute_dtype=compute_dtype,
                                out_dtype=out_dtype)


def make_params(key, *, input_channels, hidden_channels, num_hidden_layers):
    """Deterministic synthetic parameters matching FinalTanh_f2.__init__.

    start_conv and the (num_hidden_layers - 1) hidden 1x1 convs are all
    hidden_channels -> hidden_channels, so they are stacked into one tensor.
    Weights are stored already transposed to (in, out) for `x @ W`
    (i.e. conv.weight.squeeze(-1).squeeze(-1).T in PyTorch terms).
    """
    hc = hidden_channels
    ic = input_channels
    L = num_hidden_layers                      # start_conv + (L - 1) linears
    ks = jax.random.split(key, 4)
    ws = 0.2 * jax.random.normal(ks[0], (L, hc, hc), jnp.float32)
    bs = 0.2 * jax.random.normal(ks[1], (L, 1, hc), jnp.float32)
    w_out = 0.2 * jax.random.normal(ks[2], (hc, ic * hc), jnp.float32)
    b_out = 0.2 * jax.random.normal(ks[3], (1, ic * hc), jnp.float32)
    return ws, bs, w_out, b_out


def reference_forward(z, ws, bs, w_out, b_out, *, hidden_channels,
                      input_channels):
    """Pure-JAX f32 transcription of FinalTanh_f2.forward (for verification)."""
    B, N, _ = z.shape
    h = z
    for l in range(ws.shape[0]):
        h = jax.nn.relu(h @ ws[l] + bs[l])                      # (B, N, hc)
    out = jnp.tanh(h @ w_out + b_out)                           # (B, N, ic*hc)
    return out.reshape(B, N, hidden_channels, input_channels)


if __name__ == "__main__":
    # Small shapes consistent with the module's forward:
    #   z: (batch, num_nodes, hidden_channels)
    batch = 2
    num_nodes = 8
    input_channels = 4
    hidden_channels = 32
    hidden_hidden_channels = 32    # stored by the module, unused in forward
    num_hidden_layers = 3

    key = jax.random.PRNGKey(0)
    k_z, k_p = jax.random.split(key)

    z = jax.random.normal(k_z, (batch, num_nodes, hidden_channels), jnp.float32)

    ws, bs, w_out, b_out = make_params(
        k_p,
        input_channels=input_channels,
        hidden_channels=hidden_channels,
        num_hidden_layers=num_hidden_layers,
    )

    ref = reference_forward(
        z, ws, bs, w_out, b_out,
        hidden_channels=hidden_channels,
        input_channels=input_channels,
    )
    ref = jax.block_until_ready(ref)

    # 1) Exact-precision Pallas path (f32 in / f32 out) -- tight check.
    out_f32 = final_tanh_f2_pallas(
        z, ws, bs, w_out, b_out,
        hidden_channels=hidden_channels, input_channels=input_channels,
        compute_dtype=jnp.float32, out_dtype=jnp.float32)
    out_f32 = jax.block_until_ready(out_f32)
    assert out_f32.shape == (batch, num_nodes, hidden_channels, input_channels)
    assert jnp.allclose(out_f32, ref, rtol=1e-3, atol=1e-3), "f32 kernel mismatch"

    # 2) Performance-default Pallas path (bf16 I/O, f32 accumulate) -- looser
    #    tolerance vs the f32 reference due to bf16 input/weight/output casts.
    out_bf16 = final_tanh_f2_pallas(
        z, ws, bs, w_out, b_out,
        hidden_channels=hidden_channels, input_channels=input_channels)
    out_bf16 = jax.block_until_ready(out_bf16)
    assert out_bf16.dtype == jnp.bfloat16
    assert jnp.allclose(out_bf16.astype(jnp.float32), ref,
                        rtol=6e-2, atol=6e-2), "bf16 kernel mismatch"

    # 3) Dispatcher: at this tiny M it takes the XLA fallback path.
    out_disp = jax.block_until_ready(final_tanh_f2(
        z, ws, bs, w_out, b_out,
        hidden_channels=hidden_channels, input_channels=input_channels))
    assert jnp.allclose(out_disp, ref, rtol=1e-3, atol=1e-3), "fallback mismatch"

    print("KERNEL_OK")
</pallas_src>

<mosaic_0001>
module attributes {stable_mosaic.version = 11 : i64} {
  func.func @_final_tanh_f2_kernel(%arg0: i32, %arg1: memref<8x32xf32, #tpu.memory_space<vmem>>, %arg2: memref<3x32x32xf32, #tpu.memory_space<vmem>>, %arg3: memref<3x1x32xf32, #tpu.memory_space<vmem>>, %arg4: memref<32x128xf32, #tpu.memory_space<vmem>>, %arg5: memref<1x128xf32, #tpu.memory_space<vmem>>, %arg6: memref<8x128xf32, #tpu.memory_space<vmem>>) attributes {dimension_semantics = [#tpu.dimension_semantics<parallel>], iteration_bounds = array<i64: 2>, scalar_prefetch = 0 : i64, scratch_operands = 0 : i64, tpu.core_type = #tpu.core_type<tc>, window_params = [{transform_indices = @transform_0, window_bounds = array<i64: 8, 32>}, {pipeline_mode = #tpu.pipeline_mode<synchronous>, transform_indices = @transform_1, window_bounds = array<i64: 3, 32, 32>}, {pipeline_mode = #tpu.pipeline_mode<synchronous>, transform_indices = @transform_2, window_bounds = array<i64: 3, 1, 32>}, {pipeline_mode = #tpu.pipeline_mode<synchronous>, transform_indices = @transform_3, window_bounds = array<i64: 32, 128>}, {pipeline_mode = #tpu.pipeline_mode<synchronous>, transform_indices = @transform_4, window_bounds = array<i64: 1, 128>}, {transform_indices = @transform_5, window_bounds = array<i64: 8, 128>}]} {
    %c0 = arith.constant 0 : index
    %c0_0 = arith.constant 0 : index
    %0 = vector.load %arg1[%c0, %c0_0] : memref<8x32xf32, #tpu.memory_space<vmem>>, vector<8x32xf32>
    %c0_1 = arith.constant 0 : index
    %c0_2 = arith.constant 0 : index
    %c0_3 = arith.constant 0 : index
    %1 = vector.load %arg2[%c0_1, %c0_2, %c0_3] : memref<3x32x32xf32, #tpu.memory_space<vmem>>, vector<1x32x32xf32>
    %2 = vector.shape_cast %1 : vector<1x32x32xf32> to vector<32x32xf32>
    %cst = arith.constant dense<0.000000e+00> : vector<8x32xf32>
    %3 = tpu.matmul %0, %2, %cst {dimension_numbers = #tpu.dot_dimension_numbers<[1], [0], [0], [1], [0, 0, 1, 1], [], []>} : vector<8x32xf32>, vector<32x32xf32>, vector<8x32xf32> -> vector<8x32xf32>
    %c0_4 = arith.constant 0 : index
    %c0_5 = arith.constant 0 : index
    %c0_6 = arith.constant 0 : index
    %4 = vector.load %arg3[%c0_4, %c0_5, %c0_6] : memref<3x1x32xf32, #tpu.memory_space<vmem>>, vector<1x1x32xf32>
    %5 = vector.shape_cast %4 : vector<1x1x32xf32> to vector<1x32xf32>
    %6 = vector.broadcast %5 : vector<1x32xf32> to vector<8x32xf32>
    %7 = arith.addf %3, %6 : vector<8x32xf32>
    %cst_7 = arith.constant 0.000000e+00 : f32
    %8 = vector.broadcast %cst_7 : f32 to vector<8x32xf32>
    %9 = arith.maximumf %7, %8 : vector<8x32xf32>
    %c1 = arith.constant 1 : index
    %c0_8 = arith.constant 0 : index
    %c0_9 = arith.constant 0 : index
    %10 = vector.load %arg2[%c1, %c0_8, %c0_9] : memref<3x32x32xf32, #tpu.memory_space<vmem>>, vector<1x32x32xf32>
    %11 = vector.shape_cast %10 : vector<1x32x32xf32> to vector<32x32xf32>
    %cst_10 = arith.constant dense<0.000000e+00> : vector<8x32xf32>
    %12 = tpu.matmul %9, %11, %cst_10 {dimension_numbers = #tpu.dot_dimension_numbers<[1], [0], [0], [1], [0, 0, 1, 1], [], []>} : vector<8x32xf32>, vector<32x32xf32>, vector<8x32xf32> -> vector<8x32xf32>
    %c1_11 = arith.constant 1 : index
    %c0_12 = arith.constant 0 : index
    %c0_13 = arith.constant 0 : index
    %13 = vector.load %arg3[%c1_11, %c0_12, %c0_13] : memref<3x1x32xf32, #tpu.memory_space<vmem>>, vector<1x1x32xf32>
    %14 = vector.shape_cast %13 : vector<1x1x32xf32> to vector<1x32xf32>
    %15 = vector.broadcast %14 : vector<1x32xf32> to vector<8x32xf32>
    %16 = arith.addf %12, %15 : vector<8x32xf32>
    %cst_14 = arith.constant 0.000000e+00 : f32
    %17 = vector.broadcast %cst_14 : f32 to vector<8x32xf32>
    %18 = arith.maximumf %16, %17 : vector<8x32xf32>
    %c2 = arith.constant 2 : index
    %c0_15 = arith.constant 0 : index
    %c0_16 = arith.constant 0 : index
    %19 = vector.load %arg2[%c2, %c0_15, %c0_16] : memref<3x32x32xf32, #tpu.memory_space<vmem>>, vector<1x32x32xf32>
    %20 = vector.shape_cast %19 : vector<1x32x32xf32> to vector<32x32xf32>
    %cst_17 = arith.constant dense<0.000000e+00> : vector<8x32xf32>
    %21 = tpu.matmul %18, %20, %cst_17 {dimension_numbers = #tpu.dot_dimension_numbers<[1], [0], [0], [1], [0, 0, 1, 1], [], []>} : vector<8x32xf32>, vector<32x32xf32>, vector<8x32xf32> -> vector<8x32xf32>
    %c2_18 = arith.constant 2 : index
    %c0_19 = arith.constant 0 : index
    %c0_20 = arith.constant 0 : index
    %22 = vector.load %arg3[%c2_18, %c0_19, %c0_20] : memref<3x1x32xf32, #tpu.memory_space<vmem>>, vector<1x1x32xf32>
    %23 = vector.shape_cast %22 : vector<1x1x32xf32> to vector<1x32xf32>
    %24 = vector.broadcast %23 : vector<1x32xf32> to vector<8x32xf32>
    %25 = arith.addf %21, %24 : vector<8x32xf32>
    %cst_21 = arith.constant 0.000000e+00 : f32
    %26 = vector.broadcast %cst_21 : f32 to vector<8x32xf32>
    %27 = arith.maximumf %25, %26 : vector<8x32xf32>
    %c0_22 = arith.constant 0 : index
    %c0_23 = arith.constant 0 : index
    %28 = vector.load %arg4[%c0_22, %c0_23] : memref<32x128xf32, #tpu.memory_space<vmem>>, vector<32x128xf32>
    %cst_24 = arith.constant dense<0.000000e+00> : vector<8x128xf32>
    %29 = tpu.matmul %27, %28, %cst_24 {dimension_numbers = #tpu.dot_dimension_numbers<[1], [0], [0], [1], [0, 0, 1, 1], [], []>} : vector<8x32xf32>, vector<32x128xf32>, vector<8x128xf32> -> vector<8x128xf32>
    %c0_25 = arith.constant 0 : index
    %c0_26 = arith.constant 0 : index
    %30 = vector.load %arg5[%c0_25, %c0_26] : memref<1x128xf32, #tpu.memory_space<vmem>>, vector<1x128xf32>
    %31 = vector.broadcast %30 : vector<1x128xf32> to vector<8x128xf32>
    %32 = arith.addf %29, %31 : vector<8x128xf32>
    %33 = math.tanh %32 : vector<8x128xf32>
    %c0_27 = arith.constant 0 : index
    %c0_28 = arith.constant 0 : index
    %34 = vector.load %arg6[%c0_27, %c0_28] : memref<8x128xf32, #tpu.memory_space<vmem>>, vector<8x128xf32>
    tpu.vector_store %arg6[%c0_27, %c0_28], %33 {strides = array<i32>} : memref<8x128xf32, #tpu.memory_space<vmem>>, vector<8x128xf32>,
    return
  }
  func.func @transform_0(%arg0: i32) -> (i32, i32) {
    %c0_i32 = arith.constant 0 : i32
    %c0_i32_0 = arith.constant 0 : i32
    return %arg0, %c0_i32 : i32, i32
  }
  func.func @transform_1(%arg0: i32) -> (i32, i32, i32) {
    %c0_i32 = arith.constant 0 : i32
    %c0_i32_0 = arith.constant 0 : i32
    %c0_i32_1 = arith.constant 0 : i32
    %c0_i32_2 = arith.constant 0 : i32
    return %c0_i32, %c0_i32_0, %c0_i32_1 : i32, i32, i32
  }
  func.func @transform_2(%arg0: i32) -> (i32, i32, i32) {
    %c0_i32 = arith.constant 0 : i32
    %c0_i32_0 = arith.constant 0 : i32
    %c0_i32_1 = arith.constant 0 : i32
    %c0_i32_2 = arith.constant 0 : i32
    return %c0_i32, %c0_i32_0, %c0_i32_1 : i32, i32, i32
  }
  func.func @transform_3(%arg0: i32) -> (i32, i32) {
    %c0_i32 = arith.constant 0 : i32
    %c0_i32_0 = arith.constant 0 : i32
    %c0_i32_1 = arith.constant 0 : i32
    return %c0_i32, %c0_i32_0 : i32, i32
  }
  func.func @transform_4(%arg0: i32) -> (i32, i32) {
    %c0_i32 = arith.constant 0 : i32
    %c0_i32_0 = arith.constant 0 : i32
    %c0_i32_1 = arith.constant 0 : i32
    return %c0_i32, %c0_i32_0 : i32, i32
  }
  func.func @transform_5(%arg0: i32) -> (i32, i32) {
    %c0_i32 = arith.constant 0 : i32
    %c0_i32_0 = arith.constant 0 : i32
    return %arg0, %c0_i32 : i32, i32
  }
}

</mosaic_0001>

<bundles_post_ra>
// kernel: tpu_custom_call.1
= control target key start
LH: loop header
LB: loop body
LE: loop exit
PB: predicated region body
PF: predicated region fallthrough
CT: control target
= control target key end

     0   :  { %10 = vsyncpa [#allocation3], 0  ;;  %s1357_s0 = inlined_call_operand.hbm [shape: f32[16,32], index: 0, kind: input, shape index: {}]   ;;  %s1358_s1 = inlined_call_operand.hbm [shape: f32[3,32,32], index: 1, kind: input, shape index: {}]   ;;  %s1359_s2 = inlined_call_operand.vmem [shape: f32[3,1,32], index: 2, kind: input, shape index: {}]   ;;  %s1360_s3 = inlined_call_operand.hbm [shape: f32[32,128], index: 3, kind: input, shape index: {}]   ;;  %s1361_s4 = inlined_call_operand.vmem [shape: f32[1,128], index: 4, kind: input, shape index: {}]   ;;  %s1362_s5 = inlined_call_operand.hbm [shape: f32[16,128], index: 5, kind: output, shape index: {}]  }
   0x1   :  { %12 = vsyncpa [#allocation3 + $0x1], 0 }
   0x2   :  { %13 = vsyncpa [#allocation6], 0 }
   0x3   :  { %14 = vsyncpa [#allocation4], 0 }
   0x4   :  { %16 = vsyncpa [#allocation4 + $0x1], 0  ;;  %s1104_s18 = smov 0   ;;  %s1106_s19 = smov 0  }
   0x5   :  { %s1108_s20 = smov 0   ;;  %s1110_s21 = smov 0  }
   0x6 LB: > { %s1125_s22 = sadd.s32 4294967295, %s1063_s21   ;;  %s719_s23 = sadd.s32 4294967294, %s1063_s21   ;;  %s1063_s21 = sphi %s1110_s21, %s1382_s21   ;;  %s1059_s20 = sphi %s1108_s20, %s1381_s20   ;;  %s1055_s19 = sphi %s1106_s19, %s1380_s19   ;;  %s1051_s18 = sphi %s1104_s18, %s1379_s18  }
   0x7   : > { %p42_p0 = scmp.ne.s32.totalorder %s1055_s19, %s1051_s18  ;;  %p1363_p1 = scmp.eq.s32.totalorder %s1125_s22, 0 }
   0x8   : > { %p156_p3 = scmp.eq.s32.totalorder %s719_s23, 1  ;;  %p720_p5 = scmp.ge.s32.totalorder %s1063_s21, 1 }
   0x9   : > { %p1134_p4 = por %p1363_p1, %p42_p0  ;;  %p163_p7 = scmp.lt.s32.totalorder %s1063_s21, 3 }
   0xa   : > { %p1139_p6 = por %p156_p3, %p42_p0  ;;  %s1065_s27 = smov [#allocation5]  }
   0xb   : > { %s1366_s24 = scalar_select %p1134_p4, 1, 0 }
   0xc   : > { %s1367_s25 = scalar_select %p1139_p6, 1, 0 }
   0xd   : > { %p1144_p8 = pnand %p720_p5, %p163_p7  ;;  %s175_s28 = sshll.u32 %s1065_s27, 4  ;;  %s1148_s28 = int_to_ptr.vmem [resolvable:$true] %s175_s28 }
   0xe   : > { %s1066_s30 = smov [#allocation7]   ;;  %s907_s9 = scalar_lea.hbm %s1358_s1, 1536 }
   0xf   : > { %p845_p9 = pneg %p1144_p8  ;;  %s191_s6 = sshll.u32 %s1066_s30, 4  ;;  %s1159_s6 = int_to_ptr.vmem [resolvable:$true] %s191_s6 }
  0x10   : > { %p908_p12 = scmp.ne.s32.totalorder %s1358_s1, %s907_s9  ;;  %p914_p5 = scmp.lt.u32.totalorder %s907_s9, %s1358_s1 }
  0x11   : > { %p1155_p11 = pnand %p845_p9, %p1363_p1 }
  0x13   : > { %p909_p13 = pneg %p1155_p11 }
  0x15   : > { %p910_p0 = pnand %p909_p13, %p908_p12 }
  0x17   : > { %p911_p3 = pneg %p910_p0 }
  0x19   : > { %p916_p7 = pnand %p914_p5, %p911_p3 }
  0x1b   : > { %919 = shalt.err (!%p916_p7)
}
  0x1c   : > { %s920_s14 = scalar_lea.vmem %s1148_s28, 1536  ;;  %p928_p2 = scmp.lt.s32.totalorder %s1148_s28, %s1148_s28 }
  0x1d   : > { %p921_p9 = scmp.ne.s32.totalorder %s1148_s28, %s920_s14  ;;  %p929_p12 = scmp.lt.s32.totalorder %s920_s14, %s920_s14 }
  0x1f   : > { %p923_p10 = pnand %p921_p9, %p909_p13  ;;  %p930_p0 = por %p929_p12, %p928_p2 }
  0x21   : > { %p924_p1 = pneg %p923_p10 }
  0x23   : > { %p931_p6 = pnand %p930_p0, %p924_p1 }
  0x25   : > { %934 = shalt.err (!%p931_p6)
}
  0x26   : > { %s1067_s15 = smov 128   ;;  %s1068_s16 = smov 8  }
  0x27   : > { %848 = dma.hbm_to_vmem [thread:$0]  (!%p1155_p11), %s1358_s1, 1536, %s1148_s28, [#allocation6], %s1067_s15, %s1067_s15, %s1068_s16  }
  0x28   : > { %s935_s7 = scalar_lea.hbm %s1360_s3, 512 }
  0x29   : > { %p936_p2 = scmp.ne.s32.totalorder %s1360_s3, %s935_s7  ;;  %p942_p10 = scmp.lt.u32.totalorder %s935_s7, %s1360_s3 }
  0x2b   : > { %p938_p1 = pnand %p936_p2, %p909_p13 }
  0x2d   : > { %p939_p6 = pneg %p938_p1 }
  0x2f   : > { %p944_p3 = pnand %p942_p10, %p939_p6 }
  0x31   : > { %947 = shalt.err (!%p944_p3)
}
  0x32   : > { %s948_s28 = scalar_lea.vmem %s1159_s6, 512  ;;  %p956_p12 = scmp.lt.s32.totalorder %s1159_s6, %s1159_s6 }
  0x33   : > { %p949_p5 = scmp.ne.s32.totalorder %s1159_s6, %s948_s28  ;;  %p957_p0 = scmp.lt.s32.totalorder %s948_s28, %s948_s28 }
  0x35   : > { %p951_p7 = pnand %p949_p5, %p909_p13  ;;  %p958_p2 = por %p957_p0, %p956_p12 }
  0x37   : > { %p952_p9 = pneg %p951_p7 }
  0x39   : > { %p959_p1 = pnand %p958_p2, %p952_p9 }
  0x3b   : > { %962 = shalt.err (!%p959_p1)
}
  0x3c   : > { %851 = dma.hbm_to_vmem [thread:$0]  (!%p1155_p11), %s1360_s3, 512, %s1159_s6, [#allocation6], %s1067_s15, %s1067_s15, %s1068_s16  }
  0x3d   : > { %s1214_s14 = sadd.s32 1, %s1063_s21   ;;  %s29_s29 = sadd.s32 1, %s1059_s20 }
  0x3e   : > { %s26_s17 = ssub.s32 %s1063_s21, %s1214_s14  ;;  %p36_p13 = scmp.ne.s32.totalorder %s1059_s20, %s1055_s19 }
  0x3f   : > { %p27_p6 = scmp.eq.s32.totalorder %s26_s17, 0  ;;  %p37_p10 = scmp.eq.s32.totalorder %s1063_s21, 0 }
  0x40   : > { %p1370_p3 = scmp.eq.s32.totalorder %s1125_s22, 1  ;;  %p862_p7 = scmp.lt.s32.totalorder %s1063_s21, 2 }
  0x41   : > { %s1230_s27 = scalar_select %p27_p6, %s1059_s20, %s29_s29  }
  0x42   : > { %p1224_p5 = por %p1370_p3, %p36_p13  ;;  %p38_p9 = por %p37_p10, %p36_p13 }
  0x43   : > { %s208_s30 = sand.u32 1, %s1059_s20   ;;  %s725_s6 = sshll.u32 %s1063_s21, 7 }
  0x44   : > { %s1371_s23 = scalar_select %p1224_p5, 1, 0 }
  0x45   : > { %s724_s7 = sshll.u32 %s208_s30, 3  ;;  %s1237_s8 = scalar_lea.hbm %s1357_s0, %s725_s6 }
  0x46   : > { %s212_s9 = scalar_lea.vmem [#allocation2], %s724_s7  ;;  %p1241_p11 = pnand %p862_p7, %p38_p9 }
  0x47   : > { %s219_s10 = sshll.u32 %s212_s9, 4  ;;  %s209_s28 = scalar_lea.sflag [#allocation3], %s208_s30  ;;  %s1239_s10 = int_to_ptr.vmem [resolvable:$true] %s219_s10 }
  0x48   : > { %s963_s12 = scalar_lea.hbm %s1237_s8, 128  ;;  %p965_p0 = pneg %p1241_p11 }
  0x49   : > { %p964_p12 = scmp.ne.s32.totalorder %s1237_s8, %s963_s12  ;;  %s968_s17 = scalar_lea.hbm %s1357_s0, 256 }
  0x4a   : > { %p969_p13 = scmp.lt.u32.totalorder %s1237_s8, %s1357_s0  ;;  %p970_p6 = scmp.lt.u32.totalorder %s968_s17, %s963_s12 }
  0x4b   : > { %p966_p2 = pnand %p965_p0, %p964_p12  ;;  %p972_p3 = scmp.lt.u32.totalorder %s963_s12, %s1237_s8 }
  0x4c   : > { %p971_p10 = por %p970_p6, %p969_p13 }
  0x4d   : > { %p967_p1 = pneg %p966_p2 }
  0x4e   : > { %p973_p7 = por %p972_p3, %p971_p10 }
  0x50   : > { %p974_p9 = pnand %p973_p7, %p967_p1 }
  0x52   : > { %977 = shalt.err (!%p974_p9)
}
  0x53   : > { %s978_s30 = scalar_lea.vmem %s1239_s10, 128  ;;  %s1069_s15 = smov [#allocation2]  }
  0x54   : > { %p979_p12 = scmp.ne.s32.totalorder %s1239_s10, %s978_s30  ;;  %s983_s16 = sshll.u32 %s1069_s15, 4  ;;  %s984_s16 = int_to_ptr.vmem [resolvable:$false] %s983_s16 }
  0x55   : > { %s985_s9 = scalar_lea.vmem %s984_s16, 256  ;;  %p986_p4 = scmp.lt.s32.totalorder %s1239_s10, %s984_s16 }
  0x56   : > { %p981_p2 = pnand %p979_p12, %p965_p0  ;;  %p987_p13 = scmp.lt.s32.totalorder %s985_s9, %s978_s30 }
  0x58   : > { %p982_p5 = pneg %p981_p2  ;;  %p988_p6 = por %p987_p13, %p986_p4 }
  0x5a   : > { %p989_p10 = pnand %p988_p6, %p982_p5 }
  0x5c   : > { %992 = shalt.err (!%p989_p10)
}
  0x5d   : > { %855 = dma.hbm_to_vmem [thread:$0]  (!%p1241_p11), %s1237_s8, 128, %s1239_s10, %s209_s28  }
  0x5e   : > { %228 = sbr.rel (%p1144_p8) target bundleno = 1002 (0x3ea), region = 40  ;;  %s1273_s12 = sand.u32 (!%p1144_p8), 1, %s1055_s19  }
  0x5f   : > { %s727_s13 = sshll.u32 (!%p1144_p8), %s1273_s12, 3  ;;  %s231_s29 = scalar_lea.sflag (!%p1144_p8), [#allocation3], %s1273_s12 }
  0x60   : > { %s234_s17 = scalar_lea.vmem (!%p1144_p8), [#allocation2], %s727_s13  ;;  %p1373_p4 = scmp.ne.s32.totalorder (!%p1144_p8), %s1366_s24, 0 }
  0x65   : > { %1038 = dma.done.wait (%p1373_p4), %s231_s29, 128  }
  0x66   : > { %1040 = vsyncadd (%p1373_p4), %s231_s29, 4294967168  ;;  %p1374_p5 = scmp.eq.s32.totalorder %s1125_s22, 0 }
  0x68   : > { %1042 = dma.done.wait (%p1374_p5), [#allocation6], 2048   ;;  %p1375_p8 = pmov %p1374_p5 }
  0x69   : > { %v1070_v0 = vmov 0.0|0.0   ;;  %vm1071_vm0 = vmmov 0   ;;  %v1072_v1 = vmov 0.0   ;;  %v270_v2 = vld [vmem:[#allocation5] sm:$0xff]  ;;  %v271_v3 = vld [vmem:[#allocation5 + $0x8] sm:$0xff]  ;;  %v272_v4 = vld [vmem:[#allocation5 + $0x10] sm:$0xff] }
  0x6a   : > { %1044 = vsyncadd (%p1375_p8), [#allocation6], 4294965248  ;;  %809 = vmatprep.subr.bf16.mxu0 %v1070_v0  ;;  %773 = vmatprep.mubr.msk.f32.mxu0 %vm1071_vm0, %v1072_v1  ;;  %v810_v5 = vpack.c.bf16 %v271_v3, %v270_v2  ;;  %v273_v6 = vld [vmem:[#allocation5 + $0x18] sm:$0xff]  ;;  %v357_v7 = vld [vmem:[#allocation5 + $0x20] sm:$0xff]  ;;  %vm281_vm1 = vcmask 261120   ;;  %s742_s30 = sshll.u32 %s1125_s22, 7 }
  0x6b   : > { %815 = vmatprep.subr.bf16.mxu1 %v1070_v0  ;;  %784 = vmatprep.mubr.msk.f32.mxu1 %vm1071_vm0, %v1072_v1  ;;  %v358_v8 = vld [vmem:[#allocation5 + $0x28] sm:$0xff]  ;;  %v813_v9 = vpack.c.bf16 %v273_v6, %v272_v4  ;;  %v269_v11 = vld [vmem:[%s234_s17] sm:$0xff]  ;;  %v444_v15 = vld [vmem:[#allocation5 + $0x40] sm:$0xff]  ;;  %s268_s15 = scalar_lea.vmem [#allocation8], %s727_s13  ;;  %s1313_s17 = scalar_lea.hbm %s1362_s5, %s742_s30 }
  0x6c   : > { %811 = vmatpush3.bf16.msra.mxu0 %v810_v5  ;;  %v816_v10 = vpack.c.bf16 %v358_v8, %v357_v7  ;;  %v359_v12 = vld [vmem:[#allocation5 + $0x30] sm:$0xff]  ;;  %v360_v13 = vld [vmem:[#allocation5 + $0x38] sm:$0xff]  ;;  %v445_v16 = vld [vmem:[#allocation5 + $0x48] sm:$0xff]  ;;  %s630_s16 = sshll.u32 %s268_s15, 4  ;;  %s617_s24 = scalar_lea.sflag [#allocation4], %s1273_s12  ;;  %s1315_s16 = int_to_ptr.vmem [resolvable:$true] %s630_s16 }
  0x6d   : > { %812 = vmatprep.subr.bf16.mxu0 %v1070_v0  ;;  %v819_v14 = vpack.c.bf16 %v360_v13, %v359_v12  ;;  %v822_v17 = vpack.c.bf16 %v445_v16, %v444_v15  ;;  %v731_v18 = vld [vmem:[%s1359_s2] ss:$0 sm:$0xff]  ;;  %v447_v24 = vld [vmem:[#allocation5 + $0x58] sm:$0xff]  ;;  %v530_v26 = vld [vmem:[#allocation7] sm:$0xff]  ;;  %s993_s26 = scalar_lea.vmem %s1315_s16, 128  ;;  %p1376_p0 = scmp.ne.s32.totalorder %s1371_s23, 0 }
  0x6e   : > { %817 = vmatpush3.bf16.msra.mxu1 %v816_v10  ;;  %v446_v23 = vld [vmem:[#allocation5 + $0x50] sm:$0xff]  ;;  %v531_v27 = vld [vmem:[#allocation7 + $0x8] sm:$0xff]  ;;  %v533_v35 = vld [vmem:[#allocation7 + $0x18] sm:$0xff]  ;;  %p994_p11 = scmp.ne.s32.totalorder %s1315_s16, %s993_s26  ;;  %s1073_s22 = smov [#allocation8]  }
  0x6f   : > { %818 = vmatprep.subr.bf16.mxu1 %v1070_v0  ;;  %v825_v25 = vpack.c.bf16 %v447_v24, %v446_v23  ;;  %v828_v28 = vpack.c.bf16 %v531_v27, %v530_v26  ;;  %v734_v29 = vld [vmem:[%s1359_s2 + $0x1] ss:$0 sm:$0xff]  ;;  %v737_v37 = vld [vmem:[%s1359_s2 + $0x2] ss:$0 sm:$0xff]  ;;  %v739_v42 = vld [vmem:[%s1361_s4] ss:$0 sm:$0xff] }
  0x70   : > { %814 = vmatpush3.bf16.msra.mxu0 %v813_v9  ;;  %v532_v34 = vld [vmem:[#allocation7 + $0x10] sm:$0xff]  ;;  %p995_p1 = pnand %p994_p11, %p1376_p0  ;;  %s997_s13 = sshll.u32 %s1073_s22, 4  ;;  %s998_s13 = int_to_ptr.vmem [resolvable:$false] %s997_s13 }
  0x71   : > { %821 = vmatprep.subr.bf16.mxu0 %v1070_v0  ;;  %v831_v36 = vpack.c.bf16 %v533_v35, %v532_v34  ;;  %s999_s8 = scalar_lea.vmem %s998_s13, 256  ;;  %p1000_p7 = scmp.lt.s32.totalorder %s1315_s16, %s998_s13 }
  0x72   : > { %820 = vmatpush3.bf16.msra.mxu1 %v819_v14  ;;  %p996_p3 = pneg %p995_p1  ;;  %p1001_p9 = scmp.lt.s32.totalorder %s999_s8, %s993_s26 }
  0x73   : > { %774 = vmatmul.mubr.msk.f32.vlgmr.msra.gmra.mrb[0].mxu0 %vm281_vm1, %v269_v11  ;;  %827 = vmatprep.subr.bf16.mxu1 %v1070_v0 }
  0x74   : > { %795 = vmatprep.mubr.msk.f32.mxu0 %vm1071_vm0, %v1072_v1  ;;  %823 = vmatpush3.bf16.msra.mxu0 %v822_v17  ;;  %p1002_p12 = por %p1001_p9, %p1000_p7 }
  0x75   : > { %824 = vmatprep.subr.bf16.mxu0 %v1070_v0 }
  0x76   : > { %p1003_p2 = pnand %p1002_p12, %p996_p3 }
  0x78   : > { %826 = vmatpush3.bf16.msra.mxu0 %v825_v25 }
 0x146   : > { %v351_v19 = vpop.f32.mrb[0].mxu0 }
 0x147   : > { %v352_v20 = vadd.f32 %v731_v18, %v351_v19  ;;  %v775_v21 = vpop.f32.mrb[1].mxu0 }
 0x149   : > { %v355_v22 = vmax.f32 %v352_v20, 0.0 }
 0x14b   : > { %785 = vmatmul.mubr.msk.f32.vlgmr.msra.gmra.mrb[0].mxu1 %vm281_vm1, %v355_v22 }
 0x14c   : > { %806 = vmatprep.mubr.msk.f32.mxu1 %vm1071_vm0, %v1072_v1  ;;  %829 = vmatpush3.bf16.msra.mxu1 %v828_v28 }
 0x14d   : > { %830 = vmatprep.subr.bf16.mxu1 %v1070_v0 }
 0x150   : > { %832 = vmatpush3.bf16.msra.mxu1 %v831_v36 }
 0x21e   : > { %v438_v30 = vpop.f32.mrb[0].mxu1 }
 0x21f   : > { %v439_v31 = vadd.f32 %v734_v29, %v438_v30  ;;  %v786_v32 = vpop.f32.mrb[1].mxu1 }
 0x221   : > { %v442_v33 = vmax.f32 %v439_v31, 0.0 }
 0x223   : > { %796 = vmatmul.mubr.msk.f32.vlgmr.msra.gmra.mrb[2].mxu0 %vm281_vm1, %v442_v33 }
 0x2f6   : > { %v525_v38 = vpop.f32.mrb[2].mxu0 }
 0x2f7   : > { %v526_v39 = vadd.f32 %v737_v37, %v525_v38  ;;  %v797_v40 = vpop.f32.mrb[3].mxu0 }
 0x2f9   : > { %v529_v41 = vmax.f32 %v526_v39, 0.0 }
 0x2fb   : > { %807 = vmatmul.mubr.msk.f32.vlgmr.msra.gmra.mrb[2].mxu1 %vm281_vm1, %v529_v41 }
 0x3ce   : > { %v610_v43 = vpop.f32.mrb[2].mxu1 }
 0x3cf   : > { %v611_v44 = vadd.f32 %v739_v42, %v610_v43  ;;  %v808_v45 = vpop.f32.mrb[3].mxu1 }
 0x3d1   : > { %905 = vtanh.f32 %v611_v44 }
 0x3db   : > { %v906_v46 = vpop.eup %905 }
 0x3dc   : > { %615 = vst [vmem:[%s268_s15] sm:$0xff] %v906_v46 }
 0x3dd   : > { %1006 = shalt.err (!%p1003_p2)
}
 0x3de   : > { %s1007_s12 = scalar_lea.hbm %s1313_s17, 128  ;;  %s1011_s28 = scalar_lea.hbm %s1362_s5, 256 }
 0x3df   : > { %p1008_p13 = scmp.ne.s32.totalorder %s1313_s17, %s1007_s12  ;;  %p1012_p4 = scmp.lt.u32.totalorder %s1313_s17, %s1362_s5 }
 0x3e0   : > { %p1013_p5 = scmp.lt.u32.totalorder %s1011_s28, %s1007_s12  ;;  %p1015_p11 = scmp.lt.u32.totalorder %s1007_s12, %s1313_s17 }
 0x3e1   : > { %p1009_p6 = pnand %p1008_p13, %p1376_p0 }
 0x3e2   : > { %p1014_p8 = por %p1013_p5, %p1012_p4 }
 0x3e3   : > { %p1010_p10 = pneg %p1009_p6 }
 0x3e4   : > { %p1016_p1 = por %p1015_p11, %p1014_p8 }
 0x3e6   : > { %p1017_p3 = pnand %p1016_p1, %p1010_p10 }
 0x3e8   : > { %1020 = shalt.err (!%p1017_p3)
}
 0x3e9   : > { %843 = dma.vmem_to_hbm [thread:$0]  (%p1376_p0), %s1315_s16, 128, %s1313_s17, %s617_s24  }
 0x3ea PF: > { %s642_s30 = sand.u32 1, %s1051_s18   ;;  %p1377_p7 = scmp.ne.s32.totalorder %s1367_s25, 0 }
 0x3eb   : > { %p1378_p9 = scmp.ge.s32.totalorder %s1063_s21, 2  ;;  %s643_s15 = scalar_lea.sflag [#allocation4], %s642_s30 }
 0x3ed   : > { %p857_p12 = pnand %p1378_p9, %p1377_p7 }
 0x3ef   : > { %1046 = dma.done.wait (!%p857_p12), %s643_s15, 128  }
 0x3f0   : > { %1048 = vsyncadd (!%p857_p12), %s643_s15, 4294967168  ;;  %p19_p2 = scmp.ge.s32.totalorder %s1214_s14, 4   ;;  %s1379_s18 = smov %s1055_s19 }
 0x3f1   : > { %s1380_s19 = smov %s1059_s20  ;;  %s1381_s20 = smov %s1230_s27 }
 0x3f2   : > { %s1382_s21 = smov %s1214_s14  ;;  %21 = sbr.rel (!%p19_p2) target bundleno = 6 (0x6), region = 97 }
 0x3f9   :  { %648 = vsyncpa [#allocation3], 1 }
 0x3fa   :  { %650 = vsyncpa [#allocation3 + $0x1], 1 }
 0x3fb   :  { %651 = vsyncpa [#allocation6], 1 }
 0x3fc   :  { %652 = vsyncpa [#allocation4], 1 }
 0x3fd   :  { %654 = vsyncpa [#allocation4 + $0x1], 1 }

</bundles_post_ra>
